<compile_context>
chip_gen: v5e
topology: v5e:2x2
jax: 0.10.0
libtpu: 0.0.40
codegen_flags: <defaults>
</compile_context>

<pallas_src>
import jax
import jax.numpy as jnp
from jax.experimental import pallas as pl
from jax.experimental.pallas import tpu as pltpu

_LOG_2PI = 1.8378770664093453  # log(2*pi)


def _ndtri(p):
    """Standard normal inverse CDF (Acklam's rational approximation).

    Single-tail evaluation via symmetry: t = min(p, 1-p), one sqrt/log and one
    tail rational, sign-selected.  NOTE: at p in {0, 1} (and outside [0, 1])
    this returns NaN rather than +/-inf; the caller's finiteness mask maps
    those rows to -inf, which matches the reference semantics at the output.
    Accuracy ~1e-9 relative (no Halley refinement).
    """
    a0, a1, a2, a3, a4, a5 = (-3.969683028665376e+01, 2.209460984245205e+02,
                              -2.759285104469687e+02, 1.383577518672690e+02,
                              -3.066479806614716e+01, 2.506628277459239e+00)
    b0, b1, b2, b3, b4 = (-5.447609879822406e+01, 1.615858368580409e+02,
                          -1.556989798598866e+02, 6.680131188771972e+01,
                          -1.328068155288572e+01)
    c0, c1, c2, c3, c4, c5 = (-7.784894002430293e-03, -3.223964580411365e-01,
                              -2.400758277161838e+00, -2.549732539343734e+00,
                              4.374664141464968e+00, 2.938163982698783e+00)
    d0, d1, d2, d3 = (7.784695709041462e-03, 3.224671290700398e-01,
                      2.445134137142996e+00, 3.754408661907416e+00)
    plow = 0.02425

    # Central region.
    q = p - 0.5
    r = q * q
    x_c = (((((a0 * r + a1) * r + a2) * r + a3) * r + a4) * r + a5) * q / \
          (((((b0 * r + b1) * r + b2) * r + b3) * r + b4) * r + 1.0)

    # Single tail via symmetry (halves the log/sqrt + rational work).
    t = jnp.minimum(p, 1.0 - p)
    s = jnp.sqrt(-2.0 * jnp.log(t))
    x_t = (((((c0 * s + c1) * s + c2) * s + c3) * s + c4) * s + c5) / \
          ((((d0 * s + d1) * s + d2) * s + d3) * s + 1.0)
    x_t = jnp.where(q < 0.0, x_t, -x_t)

    return jnp.where(t < plow, x_t, x_c)


def ratio_kernel(theta_ref, x_ref, lower_ref, upper_ref, invscale_ref,
                 const_ref, w1_ref, b1_ref, w2_ref, b2_ref, out_ref):
    # Transposed layout: batch on the lane axis.
    theta = theta_ref[...]          # (D, TB)
    xin = x_ref[...]                # (Dx, TB)
    lower = lower_ref[...]          # (D, 1)
    upper = upper_ref[...]          # (D, 1)
    inv_scale = invscale_ref[...]   # (D, 1)
    const = const_ref[...]          # (1, 1) == -sum(log(scale)), hoisted

    D = theta.shape[0]

    # ---- Gaussian-scaled reparameterisation: probit of box-normalised theta.
    u = (theta - lower) * inv_scale
    z = _ndtri(u)                   # (D, TB)

    # ---- NPE(z, x): MLP on x -> (mu, log_sigma); both heads fused into one dot.
    h = jnp.maximum(
        jnp.dot(w1_ref[...], xin, preferred_element_type=jnp.float32)
        + b1_ref[...], 0.0)                                        # (H, TB)
    out2 = jnp.dot(w2_ref[...], h, preferred_element_type=jnp.float32) \
        + b2_ref[...]                                              # (2D, TB)
    mu = out2[:D, :]
    log_sig = out2[D:, :]
    inv_sig = jnp.exp(-log_sig)

    # npe.log_prob(z|x) - Normal(0,1).log_prob(z).sum(): the 0.5*log(2pi)*D
    # terms cancel exactly, leaving a single lane-dense sublane reduction.
    term = 0.5 * z * z - 0.5 * ((z - mu) * inv_sig) ** 2 - log_sig
    lp = const + jnp.sum(term, axis=0, keepdims=True)              # (1, TB)

    # ---- rows with any non-finite transformed theta -> -inf.
    finite = jnp.min(jnp.where(jnp.abs(z) < jnp.inf, 1.0, 0.0),
                     axis=0, keepdims=True) > 0.5
    lp = jnp.where(finite, lp, -jnp.inf)

    # ---- subtract uniform-box prior log_prob (forward = log_prob - prior).
    inb = jnp.where((theta >= lower) & (theta <= upper), 1.0, 0.0)
    in_box = jnp.min(inb, axis=0, keepdims=True) > 0.5
    prior_lp = jnp.where(in_box, const, -jnp.inf)

    out_ref[...] = lp - prior_lp                                   # (1, TB)


def _round_up(n, m):
    return ((n + m - 1) // m) * m


def gaussian_scaled_flow_ratio(theta, x, lower, upper, params, tb=512):
    B, D = theta.shape
    Dx = x.shape[1]
    H = params["w1"].shape[1]

    tb = _round_up(tb, 128)
    TB = min(tb, _round_up(B, 128))          # lane-dense tile, multiple of 128
    Bp = _round_up(B, TB)
    G = pl.cdiv(Bp, TB)

    # Hoisted, transposed host-side prep (tiny; done once in XLA).
    f32 = jnp.float32
    theta_t = jnp.pad(theta.astype(f32).T, ((0, 0), (0, Bp - B)))   # (D, Bp)
    x_t = jnp.pad(x.astype(f32).T, ((0, 0), (0, Bp - B)))           # (Dx, Bp)

    lower_c = lower.astype(f32).reshape(D, 1)
    upper_c = upper.astype(f32).reshape(D, 1)
    scale = (upper - lower).astype(f32)
    inv_scale_c = (1.0 / scale).reshape(D, 1)
    const = (-jnp.sum(jnp.log(scale))).reshape(1, 1)

    w1_t = params["w1"].astype(f32).T                               # (H, Dx)
    b1_c = params["b1"].astype(f32).reshape(H, 1)
    w2_t = jnp.concatenate(
        [params["w2m"].astype(f32).T, params["w2s"].astype(f32).T], axis=0)  # (2D, H)
    b2_c = jnp.concatenate(
        [params["b2m"].astype(f32), params["b2s"].astype(f32)]).reshape(2 * D, 1)

    stream = lambda shape: pl.BlockSpec(shape, lambda i: (0, i))    # batch-tiled
    resident = lambda shape: pl.BlockSpec(shape, lambda i: (0, 0))  # DMA once

    out = pl.pallas_call(
        ratio_kernel,
        out_shape=jax.ShapeDtypeStruct((1, Bp), jnp.float32),
        grid=(G,),
        in_specs=[
            stream((D, TB)),        # theta^T
            stream((Dx, TB)),       # x^T
            resident((D, 1)),       # lower
            resident((D, 1)),       # upper
            resident((D, 1)),       # 1/scale
            resident((1, 1)),       # -sum(log(scale))
            resident((H, Dx)),      # W1^T
            resident((H, 1)),       # b1
            resident((2 * D, H)),   # [W2mu^T; W2sig^T]
            resident((2 * D, 1)),   # [b2mu; b2sig]
        ],
        out_specs=stream((1, TB)),  # lane-dense output block
        compiler_params=pltpu.CompilerParams(
            dimension_semantics=("parallel",),
            vmem_limit_bytes=32 * 1024 * 1024),
    )(theta_t, x_t, lower_c, upper_c, inv_scale_c, const,
      w1_t, b1_c, w2_t, b2_c)

    return out[0, :B]


def _reference(theta, x, lower, upper, params):
    """Pure-JAX reference for the same forward pass (correctness check)."""
    shift, scale = lower, upper - lower
    u = (theta - shift) / scale
    z = jax.scipy.special.ndtri(u)
    h = jnp.maximum(x @ params["w1"] + params["b1"], 0.0)
    mu = h @ params["w2m"] + params["b2m"]
    log_sig = h @ params["w2s"] + params["b2s"]
    npe_lp = jnp.sum(-0.5 * ((z - mu) / jnp.exp(log_sig)) ** 2
                     - log_sig - 0.5 * _LOG_2PI, axis=-1)
    const = -jnp.sum(jnp.log(scale))
    base_lp = jnp.sum(-0.5 * z * z - 0.5 * _LOG_2PI, axis=-1)
    lp = const + npe_lp - base_lp
    lp = jnp.where(jnp.all(jnp.isfinite(z), axis=-1), lp, -jnp.inf)
    prior_lp = jnp.where(
        jnp.all((theta >= lower) & (theta <= upper), axis=-1), const, -jnp.inf)
    return lp - prior_lp


if __name__ == "__main__":
    D, Dx, H = 4, 16, 32

    key = jax.random.PRNGKey(0)
    k_th, k_x, k_w1, k_b1, k_w2m, k_b2m, k_w2s, k_b2s = jax.random.split(key, 8)

    lower = jnp.full((D,), -2.0, dtype=jnp.float32)
    upper = jnp.full((D,), 2.0, dtype=jnp.float32)

    params = {
        "w1":  0.3 * jax.random.normal(k_w1, (Dx, H), jnp.float32),
        "b1":  0.1 * jax.random.normal(k_b1, (H,), jnp.float32),
        "w2m": 0.3 * jax.random.normal(k_w2m, (H, D), jnp.float32),
        "b2m": 0.1 * jax.random.normal(k_b2m, (D,), jnp.float32),
        "w2s": 0.1 * jax.random.normal(k_w2s, (H, D), jnp.float32),
        "b2s": 0.05 * jax.random.normal(k_b2s, (D,), jnp.float32),
    }

    # Case 1: multi-tile batch (TB=512, grid=2). Theta strictly inside the box
    # so the probit is finite.
    B = 1024
    theta = jax.random.uniform(k_th, (B, D), jnp.float32, minval=-1.5, maxval=1.5)
    x = jax.random.normal(k_x, (B, Dx), jnp.float32)

    out = gaussian_scaled_flow_ratio(theta, x, lower, upper, params)
    out = jax.block_until_ready(out)
    ref = _reference(theta, x, lower, upper, params)
    assert out.shape == (B,)
    assert jnp.allclose(out, ref, rtol=1e-4, atol=1e-4), (out[:8], ref[:8])

    # Case 2: tiny batch (exercises the lane-padding path, TB=128, grid=1).
    B2 = 8
    theta2 = theta[:B2]
    x2 = x[:B2]
    out2 = gaussian_scaled_flow_ratio(theta2, x2, lower, upper, params)
    out2 = jax.block_until_ready(out2)
    ref2 = _reference(theta2, x2, lower, upper, params)
    assert out2.shape == (B2,)
    assert jnp.allclose(out2, ref2, rtol=1e-4, atol=1e-4), (out2, ref2)

    # TODO(synk): .cpu()/.get_device() host round-trips in the reference are
    # device-placement plumbing with no kernel equivalent; compute stays on TPU.
    print("KERNEL_OK")
</pallas_src>

<mosaic_0001>
module attributes {stable_mosaic.version = 11 : i64} {
  func.func @ratio_kernel(%arg0: i32, %arg1: memref<4x512xf32, #tpu.memory_space<vmem>>, %arg2: memref<16x512xf32, #tpu.memory_space<vmem>>, %arg3: memref<4x1xf32, #tpu.memory_space<vmem>>, %arg4: memref<4x1xf32, #tpu.memory_space<vmem>>, %arg5: memref<4x1xf32, #tpu.memory_space<vmem>>, %arg6: memref<1x1xf32, #tpu.memory_space<vmem>>, %arg7: memref<32x16xf32, #tpu.memory_space<vmem>>, %arg8: memref<32x1xf32, #tpu.memory_space<vmem>>, %arg9: memref<8x32xf32, #tpu.memory_space<vmem>>, %arg10: memref<8x1xf32, #tpu.memory_space<vmem>>, %arg11: memref<1x512xf32, #tpu.memory_space<vmem>>) attributes {dimension_semantics = [#tpu.dimension_semantics<parallel>], iteration_bounds = array<i64: 2>, scalar_prefetch = 0 : i64, scratch_operands = 0 : i64, tpu.core_type = #tpu.core_type<tc>, window_params = [{transform_indices = @transform_0, window_bounds = array<i64: 4, 512>}, {transform_indices = @transform_1, window_bounds = array<i64: 16, 512>}, {pipeline_mode = #tpu.pipeline_mode<synchronous>, transform_indices = @transform_2, window_bounds = array<i64: 4, 1>}, {pipeline_mode = #tpu.pipeline_mode<synchronous>, transform_indices = @transform_3, window_bounds = array<i64: 4, 1>}, {pipeline_mode = #tpu.pipeline_mode<synchronous>, transform_indices = @transform_4, window_bounds = array<i64: 4, 1>}, {pipeline_mode = #tpu.pipeline_mode<synchronous>, transform_indices = @transform_5, window_bounds = array<i64: 1, 1>}, {pipeline_mode = #tpu.pipeline_mode<synchronous>, transform_indices = @transform_6, window_bounds = array<i64: 32, 16>}, {pipeline_mode = #tpu.pipeline_mode<synchronous>, transform_indices = @transform_7, window_bounds = array<i64: 32, 1>}, {pipeline_mode = #tpu.pipeline_mode<synchronous>, transform_indices = @transform_8, window_bounds = array<i64: 8, 32>}, {pipeline_mode = #tpu.pipeline_mode<synchronous>, transform_indices = @transform_9, window_bounds = array<i64: 8, 1>}, {transform_indices = @transform_10, window_bounds = array<i64: 1, 512>}]} {
    %c0 = arith.constant 0 : index
    %c0_0 = arith.constant 0 : index
    %0 = vector.load %arg1[%c0, %c0_0] : memref<4x512xf32, #tpu.memory_space<vmem>>, vector<4x512xf32>
    %c0_1 = arith.constant 0 : index
    %c0_2 = arith.constant 0 : index
    %1 = vector.load %arg2[%c0_1, %c0_2] : memref<16x512xf32, #tpu.memory_space<vmem>>, vector<16x512xf32>
    %c0_3 = arith.constant 0 : index
    %c0_4 = arith.constant 0 : index
    %2 = vector.load %arg3[%c0_3, %c0_4] : memref<4x1xf32, #tpu.memory_space<vmem>>, vector<4x1xf32>
    %c0_5 = arith.constant 0 : index
    %c0_6 = arith.constant 0 : index
    %3 = vector.load %arg4[%c0_5, %c0_6] : memref<4x1xf32, #tpu.memory_space<vmem>>, vector<4x1xf32>
    %c0_7 = arith.constant 0 : index
    %c0_8 = arith.constant 0 : index
    %4 = vector.load %arg5[%c0_7, %c0_8] : memref<4x1xf32, #tpu.memory_space<vmem>>, vector<4x1xf32>
    %c0_9 = arith.constant 0 : index
    %c0_10 = arith.constant 0 : index
    %5 = vector.load %arg6[%c0_9, %c0_10] : memref<1x1xf32, #tpu.memory_space<vmem>>, vector<1x1xf32>
    %6 = vector.broadcast %2 : vector<4x1xf32> to vector<4x512xf32>
    %7 = arith.subf %0, %6 : vector<4x512xf32>
    %8 = vector.broadcast %4 : vector<4x1xf32> to vector<4x512xf32>
    %9 = arith.mulf %7, %8 : vector<4x512xf32>
    %cst = arith.constant 5.000000e-01 : f32
    %10 = vector.broadcast %cst : f32 to vector<4x512xf32>
    %11 = arith.subf %9, %10 : vector<4x512xf32>
    %12 = arith.mulf %11, %11 : vector<4x512xf32>
    %cst_11 = arith.constant -39.6968307 : f32
    %13 = vector.broadcast %cst_11 : f32 to vector<4x512xf32>
    %14 = arith.mulf %13, %12 : vector<4x512xf32>
    %cst_12 = arith.constant 220.946106 : f32
    %15 = vector.broadcast %cst_12 : f32 to vector<4x512xf32>
    %16 = arith.addf %14, %15 : vector<4x512xf32>
    %17 = arith.mulf %16, %12 : vector<4x512xf32>
    %cst_13 = arith.constant -275.928497 : f32
    %18 = vector.broadcast %cst_13 : f32 to vector<4x512xf32>
    %19 = arith.addf %17, %18 : vector<4x512xf32>
    %20 = arith.mulf %19, %12 : vector<4x512xf32>
    %cst_14 = arith.constant 138.357758 : f32
    %21 = vector.broadcast %cst_14 : f32 to vector<4x512xf32>
    %22 = arith.addf %20, %21 : vector<4x512xf32>
    %23 = arith.mulf %22, %12 : vector<4x512xf32>
    %cst_15 = arith.constant -30.6647987 : f32
    %24 = vector.broadcast %cst_15 : f32 to vector<4x512xf32>
    %25 = arith.addf %23, %24 : vector<4x512xf32>
    %26 = arith.mulf %25, %12 : vector<4x512xf32>
    %cst_16 = arith.constant 2.50662827 : f32
    %27 = vector.broadcast %cst_16 : f32 to vector<4x512xf32>
    %28 = arith.addf %26, %27 : vector<4x512xf32>
    %29 = arith.mulf %28, %11 : vector<4x512xf32>
    %cst_17 = arith.constant -54.4760971 : f32
    %30 = vector.broadcast %cst_17 : f32 to vector<4x512xf32>
    %31 = arith.mulf %30, %12 : vector<4x512xf32>
    %cst_18 = arith.constant 161.585831 : f32
    %32 = vector.broadcast %cst_18 : f32 to vector<4x512xf32>
    %33 = arith.addf %31, %32 : vector<4x512xf32>
    %34 = arith.mulf %33, %12 : vector<4x512xf32>
    %cst_19 = arith.constant -155.698975 : f32
    %35 = vector.broadcast %cst_19 : f32 to vector<4x512xf32>
    %36 = arith.addf %34, %35 : vector<4x512xf32>
    %37 = arith.mulf %36, %12 : vector<4x512xf32>
    %cst_20 = arith.constant 66.8013153 : f32
    %38 = vector.broadcast %cst_20 : f32 to vector<4x512xf32>
    %39 = arith.addf %37, %38 : vector<4x512xf32>
    %40 = arith.mulf %39, %12 : vector<4x512xf32>
    %cst_21 = arith.constant -13.2806816 : f32
    %41 = vector.broadcast %cst_21 : f32 to vector<4x512xf32>
    %42 = arith.addf %40, %41 : vector<4x512xf32>
    %43 = arith.mulf %42, %12 : vector<4x512xf32>
    %cst_22 = arith.constant 1.000000e+00 : f32
    %44 = vector.broadcast %cst_22 : f32 to vector<4x512xf32>
    %45 = arith.addf %43, %44 : vector<4x512xf32>
    %46 = arith.divf %29, %45 : vector<4x512xf32>
    %cst_23 = arith.constant 1.000000e+00 : f32
    %47 = vector.broadcast %cst_23 : f32 to vector<4x512xf32>
    %48 = arith.subf %47, %9 : vector<4x512xf32>
    %49 = arith.minimumf %9, %48 : vector<4x512xf32>
    %50 = math.log %49 : vector<4x512xf32>
    %cst_24 = arith.constant -2.000000e+00 : f32
    %51 = vector.broadcast %cst_24 : f32 to vector<4x512xf32>
    %52 = arith.mulf %51, %50 : vector<4x512xf32>
    %53 = math.sqrt %52 : vector<4x512xf32>
    %cst_25 = arith.constant -0.0077848942 : f32
    %54 = vector.broadcast %cst_25 : f32 to vector<4x512xf32>
    %55 = arith.mulf %54, %53 : vector<4x512xf32>
    %cst_26 = arith.constant -0.322396457 : f32
    %56 = vector.broadcast %cst_26 : f32 to vector<4x512xf32>
    %57 = arith.addf %55, %56 : vector<4x512xf32>
    %58 = arith.mulf %57, %53 : vector<4x512xf32>
    %cst_27 = arith.constant -2.40075827 : f32
    %59 = vector.broadcast %cst_27 : f32 to vector<4x512xf32>
    %60 = arith.addf %58, %59 : vector<4x512xf32>
    %61 = arith.mulf %60, %53 : vector<4x512xf32>
    %cst_28 = arith.constant -2.54973245 : f32
    %62 = vector.broadcast %cst_28 : f32 to vector<4x512xf32>
    %63 = arith.addf %61, %62 : vector<4x512xf32>
    %64 = arith.mulf %63, %53 : vector<4x512xf32>
    %cst_29 = arith.constant 4.37466431 : f32
    %65 = vector.broadcast %cst_29 : f32 to vector<4x512xf32>
    %66 = arith.addf %64, %65 : vector<4x512xf32>
    %67 = arith.mulf %66, %53 : vector<4x512xf32>
    %cst_30 = arith.constant 2.938164 : f32
    %68 = vector.broadcast %cst_30 : f32 to vector<4x512xf32>
    %69 = arith.addf %67, %68 : vector<4x512xf32>
    %cst_31 = arith.constant 0.00778469583 : f32
    %70 = vector.broadcast %cst_31 : f32 to vector<4x512xf32>
    %71 = arith.mulf %70, %53 : vector<4x512xf32>
    %cst_32 = arith.constant 0.322467119 : f32
    %72 = vector.broadcast %cst_32 : f32 to vector<4x512xf32>
    %73 = arith.addf %71, %72 : vector<4x512xf32>
    %74 = arith.mulf %73, %53 : vector<4x512xf32>
    %cst_33 = arith.constant 2.44513416 : f32
    %75 = vector.broadcast %cst_33 : f32 to vector<4x512xf32>
    %76 = arith.addf %74, %75 : vector<4x512xf32>
    %77 = arith.mulf %76, %53 : vector<4x512xf32>
    %cst_34 = arith.constant 3.7544086 : f32
    %78 = vector.broadcast %cst_34 : f32 to vector<4x512xf32>
    %79 = arith.addf %77, %78 : vector<4x512xf32>
    %80 = arith.mulf %79, %53 : vector<4x512xf32>
    %cst_35 = arith.constant 1.000000e+00 : f32
    %81 = vector.broadcast %cst_35 : f32 to vector<4x512xf32>
    %82 = arith.addf %80, %81 : vector<4x512xf32>
    %83 = arith.divf %69, %82 : vector<4x512xf32>
    %cst_36 = arith.constant 0.000000e+00 : f32
    %84 = vector.broadcast %cst_36 : f32 to vector<4x512xf32>
    %85 = arith.cmpf olt, %11, %84 : vector<4x512xf32>
    %cst_37 = arith.constant 0.000000e+00 : f32
    %86 = vector.broadcast %cst_37 : f32 to vector<4x512xf32>
    %87 = arith.subf %86, %83 : vector<4x512xf32>
    %88 = arith.select %85, %83, %87 : vector<4x512xi1>, vector<4x512xf32>
    %cst_38 = arith.constant 2.425000e-02 : f32
    %89 = vector.broadcast %cst_38 : f32 to vector<4x512xf32>
    %90 = arith.cmpf olt, %49, %89 : vector<4x512xf32>
    %91 = arith.select %90, %88, %46 : vector<4x512xi1>, vector<4x512xf32>
    %c0_39 = arith.constant 0 : index
    %c0_40 = arith.constant 0 : index
    %92 = vector.load %arg7[%c0_39, %c0_40] : memref<32x16xf32, #tpu.memory_space<vmem>>, vector<32x16xf32>
    %cst_41 = arith.constant dense<0.000000e+00> : vector<32x512xf32>
    %93 = tpu.matmul %92, %1, %cst_41 {dimension_numbers = #tpu.dot_dimension_numbers<[1], [0], [0], [1], [0, 0, 1, 1], [], []>} : vector<32x16xf32>, vector<16x512xf32>, vector<32x512xf32> -> vector<32x512xf32>
    %c0_42 = arith.constant 0 : index
    %c0_43 = arith.constant 0 : index
    %94 = vector.load %arg8[%c0_42, %c0_43] : memref<32x1xf32, #tpu.memory_space<vmem>>, vector<32x1xf32>
    %95 = vector.broadcast %94 : vector<32x1xf32> to vector<32x512xf32>
    %96 = arith.addf %93, %95 : vector<32x512xf32>
    %cst_44 = arith.constant 0.000000e+00 : f32
    %97 = vector.broadcast %cst_44 : f32 to vector<32x512xf32>
    %98 = arith.maximumf %96, %97 : vector<32x512xf32>
    %c0_45 = arith.constant 0 : index
    %c0_46 = arith.constant 0 : index
    %99 = vector.load %arg9[%c0_45, %c0_46] : memref<8x32xf32, #tpu.memory_space<vmem>>, vector<8x32xf32>
    %cst_47 = arith.constant dense<0.000000e+00> : vector<8x512xf32>
    %100 = tpu.matmul %99, %98, %cst_47 {dimension_numbers = #tpu.dot_dimension_numbers<[1], [0], [0], [1], [0, 0, 1, 1], [], []>} : vector<8x32xf32>, vector<32x512xf32>, vector<8x512xf32> -> vector<8x512xf32>
    %c0_48 = arith.constant 0 : index
    %c0_49 = arith.constant 0 : index
    %101 = vector.load %arg10[%c0_48, %c0_49] : memref<8x1xf32, #tpu.memory_space<vmem>>, vector<8x1xf32>
    %102 = vector.broadcast %101 : vector<8x1xf32> to vector<8x512xf32>
    %103 = arith.addf %100, %102 : vector<8x512xf32>
    %104 = vector.extract_strided_slice %103 {offsets = [0, 0], sizes = [4, 512], strides = [1, 1]} : vector<8x512xf32> to vector<4x512xf32>
    %105 = vector.extract_strided_slice %103 {offsets = [4, 0], sizes = [4, 512], strides = [1, 1]} : vector<8x512xf32> to vector<4x512xf32>
    %cst_50 = arith.constant 0.000000e+00 : f32
    %106 = vector.broadcast %cst_50 : f32 to vector<4x512xf32>
    %107 = arith.subf %106, %105 : vector<4x512xf32>
    %108 = math.exp %107 : vector<4x512xf32>
    %cst_51 = arith.constant 5.000000e-01 : f32
    %109 = vector.broadcast %cst_51 : f32 to vector<4x512xf32>
    %110 = arith.mulf %109, %91 : vector<4x512xf32>
    %111 = arith.mulf %110, %91 : vector<4x512xf32>
    %112 = arith.subf %91, %104 : vector<4x512xf32>
    %113 = arith.mulf %112, %108 : vector<4x512xf32>
    %114 = arith.mulf %113, %113 : vector<4x512xf32>
    %cst_52 = arith.constant 5.000000e-01 : f32
    %115 = vector.broadcast %cst_52 : f32 to vector<4x512xf32>
    %116 = arith.mulf %115, %114 : vector<4x512xf32>
    %117 = arith.subf %111, %116 : vector<4x512xf32>
    %118 = arith.subf %117, %105 : vector<4x512xf32>
    %cst_53 = arith.constant dense<0.000000e+00> : vector<512xf32>
    %119 = vector.multi_reduction <add>, %118, %cst_53 [0] : vector<4x512xf32> to vector<512xf32>
    %120 = vector.shape_cast %119 : vector<512xf32> to vector<1x512xf32>
    %121 = vector.broadcast %5 : vector<1x1xf32> to vector<1x512xf32>
    %122 = arith.addf %121, %120 : vector<1x512xf32>
    %123 = math.absf %91 : vector<4x512xf32>
    %cst_54 = arith.constant 0x7F800000 : f32
    %124 = vector.broadcast %cst_54 : f32 to vector<4x512xf32>
    %125 = arith.cmpf olt, %123, %124 : vector<4x512xf32>
    %cst_55 = arith.constant 1.000000e+00 : f32
    %cst_56 = arith.constant 0.000000e+00 : f32
    %126 = vector.broadcast %cst_55 : f32 to vector<4x512xf32>
    %127 = vector.broadcast %cst_56 : f32 to vector<4x512xf32>
    %128 = arith.select %125, %126, %127 : vector<4x512xi1>, vector<4x512xf32>
    %cst_57 = arith.constant dense<0x7F800000> : vector<512xf32>
    %129 = vector.multi_reduction <minimumf>, %128, %cst_57 [0] : vector<4x512xf32> to vector<512xf32>
    %130 = vector.shape_cast %129 : vector<512xf32> to vector<1x512xf32>
    %cst_58 = arith.constant 5.000000e-01 : f32
    %131 = vector.broadcast %cst_58 : f32 to vector<1x512xf32>
    %132 = arith.cmpf ogt, %130, %131 : vector<1x512xf32>
    %cst_59 = arith.constant 0xFF800000 : f32
    %133 = vector.broadcast %cst_59 : f32 to vector<1x512xf32>
    %134 = arith.select %132, %122, %133 : vector<1x512xi1>, vector<1x512xf32>
    %135 = vector.broadcast %2 : vector<4x1xf32> to vector<4x512xf32>
    %136 = arith.cmpf oge, %0, %135 : vector<4x512xf32>
    %137 = vector.broadcast %3 : vector<4x1xf32> to vector<4x512xf32>
    %138 = arith.cmpf ole, %0, %137 : vector<4x512xf32>
    %139 = arith.andi %136, %138 : vector<4x512xi1>
    %cst_60 = arith.constant 1.000000e+00 : f32
    %cst_61 = arith.constant 0.000000e+00 : f32
    %140 = vector.broadcast %cst_60 : f32 to vector<4x512xf32>
    %141 = vector.broadcast %cst_61 : f32 to vector<4x512xf32>
    %142 = arith.select %139, %140, %141 : vector<4x512xi1>, vector<4x512xf32>
    %cst_62 = arith.constant dense<0x7F800000> : vector<512xf32>
    %143 = vector.multi_reduction <minimumf>, %142, %cst_62 [0] : vector<4x512xf32> to vector<512xf32>
    %144 = vector.shape_cast %143 : vector<512xf32> to vector<1x512xf32>
    %cst_63 = arith.constant 5.000000e-01 : f32
    %145 = vector.broadcast %cst_63 : f32 to vector<1x512xf32>
    %146 = arith.cmpf ogt, %144, %145 : vector<1x512xf32>
    %cst_64 = arith.constant 0xFF800000 : f32
    %147 = vector.shape_cast %5 : vector<1x1xf32> to vector<1x1xf32>
    %148 = vector.broadcast %147 : vector<1x1xf32> to vector<1x512xf32>
    %149 = vector.broadcast %cst_64 : f32 to vector<1x512xf32>
    %150 = arith.select %146, %148, %149 : vector<1x512xi1>, vector<1x512xf32>
    %151 = arith.subf %134, %150 : vector<1x512xf32>
    %c0_65 = arith.constant 0 : index
    %c0_66 = arith.constant 0 : index
    %152 = vector.load %arg11[%c0_65, %c0_66] : memref<1x512xf32, #tpu.memory_space<vmem>>, vector<1x512xf32>
    tpu.vector_store %arg11[%c0_65, %c0_66], %151 {strides = array<i32>} : memref<1x512xf32, #tpu.memory_space<vmem>>, vector<1x512xf32>,
    return
  }
  func.func @transform_0(%arg0: i32) -> (i32, i32) {
    %c0_i32 = arith.constant 0 : i32
    %c0_i32_0 = arith.constant 0 : i32
    return %c0_i32, %arg0 : i32, i32
  }
  func.func @transform_1(%arg0: i32) -> (i32, i32) {
    %c0_i32 = arith.constant 0 : i32
    %c0_i32_0 = arith.constant 0 : i32
    return %c0_i32, %arg0 : i32, i32
  }
  func.func @transform_2(%arg0: i32) -> (i32, i32) {
    %c0_i32 = arith.constant 0 : i32
    %c0_i32_0 = arith.constant 0 : i32
    %c0_i32_1 = arith.constant 0 : i32
    return %c0_i32, %c0_i32_0 : i32, i32
  }
  func.func @transform_3(%arg0: i32) -> (i32, i32) {
    %c0_i32 = arith.constant 0 : i32
    %c0_i32_0 = arith.constant 0 : i32
    %c0_i32_1 = arith.constant 0 : i32
    return %c0_i32, %c0_i32_0 : i32, i32
  }
  func.func @transform_4(%arg0: i32) -> (i32, i32) {
    %c0_i32 = arith.constant 0 : i32
    %c0_i32_0 = arith.constant 0 : i32
    %c0_i32_1 = arith.constant 0 : i32
    return %c0_i32, %c0_i32_0 : i32, i32
  }
  func.func @transform_5(%arg0: i32) -> (i32, i32) {
    %c0_i32 = arith.constant 0 : i32
    %c0_i32_0 = arith.constant 0 : i32
    %c0_i32_1 = arith.constant 0 : i32
    return %c0_i32, %c0_i32_0 : i32, i32
  }
  func.func @transform_6(%arg0: i32) -> (i32, i32) {
    %c0_i32 = arith.constant 0 : i32
    %c0_i32_0 = arith.constant 0 : i32
    %c0_i32_1 = arith.constant 0 : i32
    return %c0_i32, %c0_i32_0 : i32, i32
  }
  func.func @transform_7(%arg0: i32) -> (i32, i32) {
    %c0_i32 = arith.constant 0 : i32
    %c0_i32_0 = arith.constant 0 : i32
    %c0_i32_1 = arith.constant 0 : i32
    return %c0_i32, %c0_i32_0 : i32, i32
  }
  func.func @transform_8(%arg0: i32) -> (i32, i32) {
    %c0_i32 = arith.constant 0 : i32
    %c0_i32_0 = arith.constant 0 : i32
    %c0_i32_1 = arith.constant 0 : i32
    return %c0_i32, %c0_i32_0 : i32, i32
  }
  func.func @transform_9(%arg0: i32) -> (i32, i32) {
    %c0_i32 = arith.constant 0 : i32
    %c0_i32_0 = arith.constant 0 : i32
    %c0_i32_1 = arith.constant 0 : i32
    return %c0_i32, %c0_i32_0 : i32, i32
  }
  func.func @transform_10(%arg0: i32) -> (i32, i32) {
    %c0_i32 = arith.constant 0 : i32
    %c0_i32_0 = arith.constant 0 : i32
    return %c0_i32, %arg0 : i32, i32
  }
}

</mosaic_0001>

<bundles_post_ra>
// kernel: tpu_custom_call.1
= control target key start
LH: loop header
LB: loop body
LE: loop exit
PB: predicated region body
PF: predicated region fallthrough
CT: control target
= control target key end

     0   :  { %s1950_s0 = inlined_call_operand.vmem [shape: f32[4,1024], index: 0, kind: input, shape index: {}]   ;;  %s1951_s1 = inlined_call_operand.hbm [shape: f32[16,1024], index: 1, kind: input, shape index: {}]   ;;  %s1952_s2 = inlined_call_operand.vmem [shape: f32[4,1], index: 2, kind: input, shape index: {}]   ;;  %s1953_s3 = inlined_call_operand.vmem [shape: f32[4,1], index: 3, kind: input, shape index: {}]   ;;  %s1954_s4 = inlined_call_operand.vmem [shape: f32[4,1], index: 4, kind: input, shape index: {}]   ;;  %s1955_s5 = inlined_call_operand.<no memory space> [shape: f32[1,1], index: 5, kind: input, shape index: {}]   ;;  %s1956_s6 = inlined_call_operand.vmem [shape: f32[32,16], index: 6, kind: input, shape index: {}]   ;;  %s1957_s7 = inlined_call_operand.vmem [shape: f32[32,1], index: 7, kind: input, shape index: {}]   ;;  %s1958_s8 = inlined_call_operand.vmem [shape: f32[8,32], index: 8, kind: input, shape index: {}]   ;;  %s1959_s9 = inlined_call_operand.vmem [shape: f32[8,1], index: 9, kind: input, shape index: {}]   ;;  %s1960_s10 = inlined_call_operand.hbm [shape: f32[1,1024], index: 10, kind: output, shape index: {}]  }
   0x1   :  { %v15_v0 = vstv %s1955_s5 }
   0x2   :  { %16 = vst [vmem:[#allocation2] sm:$0x1] %v15_v0 }
   0x3   :  { %17 = vsyncpa [#allocation4], 0 }
   0x4   :  { %19 = vsyncpa [#allocation4 + $0x1], 0 }
   0x5   :  { %20 = vsyncpa [#allocation5], 0 }
   0x6   :  { %22 = vsyncpa [#allocation5 + $0x1], 0  ;;  %s1527_s15 = smov 0   ;;  %s1529_s16 = smov 0  }
   0x7   :  { %s1531_s17 = smov 0   ;;  %s1533_s18 = smov 0  }
   0x8 LB: > { %1964 = sst [smem:[#allocation9_spill]] %s1457_s17  ;;  %s1548_s5 = sadd.s32 4294967295, %s1461_s18   ;;  %s1461_s18 = sphi %s1533_s18, %s1986_s18   ;;  %s1457_s17 = sphi %s1531_s17, %s1988_s17   ;;  %s1453_s16 = sphi %s1529_s16, %s1990_s16   ;;  %s1449_s15 = sphi %s1527_s15, %s1989_s15  }
   0x9   : > { %s1248_s19 = sadd.s32 4294967294, %s1461_s18   ;;  %s1552_s20 = sadd.s32 1, %s1461_s18  }
   0xa   : > { %1965 = sst [smem:[#allocation10_spill]] %s1552_s20  ;;  %s61_s21 = sadd.s32 1, %s1457_s17 }
   0xb   : > { %s58_s22 = ssub.s32 %s1461_s18, %s1552_s20  ;;  %p68_p0 = scmp.ne.s32.totalorder %s1457_s17, %s1453_s16 }
   0xc   : > { %p59_p1 = scmp.eq.s32.totalorder %s58_s22, 0  ;;  %p69_p2 = scmp.eq.s32.totalorder %s1461_s18, 0 }
   0xd   : > { %p74_p3 = scmp.ne.s32.totalorder %s1453_s16, %s1449_s15  ;;  %p75_p4 = scmp.eq.s32.totalorder %s1548_s5, 0 }
   0xe   : > { %s1564_s23 = scalar_select %p59_p1, %s1457_s17, %s61_s21  }
   0xf   : > { %p1566_p5 = por %p69_p2, %p68_p0  ;;  %p1570_p6 = por %p75_p4, %p74_p3 }
  0x10   : > { %1966 = sst [smem:[#allocation11_spill]] %s1564_s23  ;;  %p266_p7 = scmp.eq.s32.totalorder %s1548_s5, 1 }
  0x11   : > { %p272_p8 = scmp.eq.s32.totalorder %s1248_s19, 1  ;;  %p1250_p9 = scmp.ge.s32.totalorder %s1461_s18, 2 }
  0x12   : > { %p1298_p10 = scmp.lt.s32.totalorder %s1461_s18, 2  ;;  %p1577_p11 = por %p266_p7, %p68_p0 }
  0x13   : > { %p1581_p12 = por %p272_p8, %p74_p3  ;;  %s325_s28 = sand.u32 1, %s1457_s17  }
  0x14   : > { %s1285_s29 = sshll.u32 %s1461_s18, 5  ;;  %s1251_s30 = sshll.u32 %s325_s28, 6 }
  0x15   : > { %s334_s13 = scalar_lea.hbm %s1951_s1, %s1285_s29  ;;  %s329_s21 = scalar_lea.vmem [#allocation3], %s1251_s30 }
  0x16   : > { %s335_s14 = sshll.u32 %s334_s13, 4  ;;  %s337_s19 = sshll.u32 %s329_s21, 4  ;;  %s336_s14 = int_to_ptr.hbm [resolvable:$true] %s335_s14  ;;  %s338_s19 = int_to_ptr.vmem [resolvable:$true] %s337_s19 }
  0x17   : > { %p1592_p13 = pnand %p1298_p10, %p1566_p5  ;;  %p1254_p0 = scmp.ge.s32.totalorder %s1461_s18, 1 }
  0x18   : > { %s326_s23 = scalar_lea.sflag [#allocation4], %s325_s28  ;;  %s1365_s17 = sshra.s32 %s336_s14, 4  ;;  %s1366_s17 = int_to_ptr.hbm [resolvable:$true] %s1365_s17 }
  0x19   : > { %s1367_s20 = scalar_lea.hbm %s1366_s17, 64  ;;  %p1369_p2 = pneg %p1592_p13 }
  0x1a   : > { %p1368_p1 = scmp.ne.s32.totalorder %s1366_s17, %s1367_s20  ;;  %s1372_s11 = scalar_lea.hbm %s1951_s1, 128 }
  0x1b   : > { %p1373_p5 = scmp.lt.s32.totalorder %s1366_s17, %s1951_s1  ;;  %p1374_p7 = scmp.lt.s32.totalorder %s1372_s11, %s1367_s20 }
  0x1c   : > { %p1370_p3 = pnand %p1369_p2, %p1368_p1 }
  0x1d   : > { %p1375_p8 = por %p1374_p7, %p1373_p5 }
  0x1e   : > { %p1371_p4 = pneg %p1370_p3 }
  0x20   : > { %p1376_p10 = pnand %p1375_p8, %p1371_p4 }
  0x22   : > { %1379 = shalt.err (!%p1376_p10)
}
  0x23   : > { %s1463_s28 = smov 1024   ;;  %s1464_s13 = smov 512  }
  0x24   : > { %s1465_s21 = smov 32   ;;  %p345_p1 = scmp.lt.s32.totalorder %s1461_s18, 3 }
  0x25   : > { %1293 = dma.hbm_to_vmem [thread:$0]  (!%p1592_p13), %s336_s14, 1024, %s338_s19, %s326_s23, %s1463_s28, %s1464_s13, %s1465_s21  }
  0x26   : > { %p346_p2 = pnand %p1254_p0, %p345_p1 }
  0x27   : > { %s1611_s29 = sand.u32 (!%p346_p2), 1, %s1453_s16  }
  0x28   : > { %349 = sbr.rel (%p346_p2) target bundleno = 433 (0x1b1), region = 60  ;;  %s1255_s17 = sshll.u32 (!%p346_p2), %s1611_s29, 6 }
  0x29   : > { %s352_s20 = scalar_lea.sflag (!%p346_p2), [#allocation4], %s1611_s29  ;;  %s355_s30 = scalar_lea.vmem (!%p346_p2), [#allocation3], %s1255_s17 }
  0x2d   : > { %1440 = dma.done.wait (%p1570_p6), %s352_s20, 1024  }
  0x2e   : > { %1442 = vsyncadd (%p1570_p6), %s352_s20, 4294966272  ;;  %v1466_v1 = vmov 0   ;;  %v412_v2 = vld [vmem:[%s355_s30 + $0x20] sm:$0xff]  ;;  %v413_v3 = vld [vmem:[%s355_s30 + $0x28] sm:$0xff]  ;;  %vm656_vm0 = vcmask 130048   ;;  %s1672_s21 = sshll.u32 %s1548_s5, 2 }
  0x2f   : > { %1339 = vset.pattern.permute.xlu1 %v1466_v1  ;;  %1338 = vset.pattern.permute.xlu0 %v1466_v1  ;;  %v414_v4 = vld [vmem:[%s355_s30 + $0x30] sm:$0xff]  ;;  %v415_v5 = vld [vmem:[%s355_s30 + $0x38] sm:$0xff]  ;;  %v408_v6 = vld [vmem:[%s355_s30] sm:$0xff]  ;;  %p399_p6 = scmp.lt.s32.totalorder %s1672_s21, 7  ;;  %v1467_v24 = vmov 839922192   ;;  %s1161_s24 = scalar_lea.hbm %s1960_s10, %s1672_s21 }
  0x30   : > { %1340 = vset.pattern.permute.xlu2 %v1466_v1  ;;  %683 = vmatpush.msra.mxu0 %v412_v2  ;;  %v409_v7 = vld [vmem:[%s355_s30 + $0x8] sm:$0xff]  ;;  %v410_v8 = vld [vmem:[%s355_s30 + $0x10] sm:$0xff]  ;;  %v411_v9 = vld [vmem:[%s355_s30 + $0x18] sm:$0xff]  ;;  %v425_v25 = vunpack.c.l.s4 %v1467_v24  ;;  %vm808_vm7 = vcmask 261120   ;;  %s1256_s19 = sshll.u32 %s1611_s29, 2  ;;  %s1165_s13 = sshll.u32 %s1161_s24, 4  ;;  %s1166_s13 = int_to_ptr.hbm [resolvable:$true] %s1165_s13 }
  0x31   : > { %712 = vmatpush.msra.mxu1 %v413_v3  ;;  %741 = vmatpush.msra.mxu2 %v414_v4  ;;  %v628_v10 = vld [vmem:[%s1956_s6] sm:$0xff]  ;;  %v633_v11 = vld [vmem:[%s1957_s7 + $0x8] sm:$0xff]  ;;  %v635_v12 = vld [vmem:[%s1957_s7 + $0x18] sm:$0xff]  ;;  %s400_s17 = scalar_select %p399_p6, %s1672_s21, 7 }
  0x32   : > { %770 = vmatpush.msra.mxu3 %v415_v5  ;;  %684 = vmatpush.msra.mxu0 %v408_v6  ;;  %v416_v13 = vld [vmem:[%s1952_s2] sm:$0xf]  ;;  %v629_v14 = vld [vmem:[%s1956_s6 + $0x8] sm:$0xff]  ;;  %v634_v16 = vld [vmem:[%s1957_s7 + $0x10] sm:$0xff]  ;;  %v1681_v26 = vunpack.c.0.s8 %v425_v25  ;;  %s397_s12 = scalar_lea.vmem [#allocation6], %s1256_s19  ;;  %s1151_s21 = scalar_lea.sflag [#allocation5], %s1611_s29 }
  0x33   : > { %713 = vmatpush.msra.mxu1 %v409_v7  ;;  %742 = vmatpush.msra.mxu2 %v410_v8  ;;  %v632_v15 = vld [vmem:[%s1957_s7] sm:$0xff]  ;;  %v630_v18 = vld [vmem:[%s1956_s6 + $0x10] sm:$0xff]  ;;  %v631_v21 = vld [vmem:[%s1956_s6 + $0x18] sm:$0xff]  ;;  %s1258_s20 = sshll.u32 %s400_s17, 2  ;;  %s1163_s28 = sshll.u32 %s397_s12, 4  ;;  %s1164_s28 = int_to_ptr.vmem [resolvable:$true] %s1163_s28 }
  0x34   : > { %771 = vmatpush.msra.mxu3 %v411_v9  ;;  %1261 = vmatmul.msk.f32.vlgmr.msra.gmra.mxu0 %vm656_vm0, %v628_v10  ;;  %v418_v17 = vld [vmem:[%s1954_s4] sm:$0xf]  ;;  %v419_v22 = vld [vmem:[#allocation2] sm:$0x1]  ;;  %s402_s14 = scalar_lea.vmem %s1950_s0, %s1258_s20  ;;  %s1409_s17 = sshra.s32 %s1166_s13, 4  ;;  %s1410_s17 = int_to_ptr.hbm [resolvable:$true] %s1409_s17 }
  0x35   : > { %1265 = vmatmul.msk.f32.vlgmr.msra.gmra.mxu1 %vm656_vm0, %v628_v10  ;;  %1269 = vmatmul.msk.f32.vlgmr.msra.gmra.mxu2 %vm656_vm0, %v628_v10  ;;  %v802_v19 = vld [vmem:[%s1959_s9] sm:$0xff]  ;;  %v1688_v30 = vld [vmem:[%s402_s14 + $0x8] sm:$0xff]  ;;  %s1411_s20 = scalar_lea.hbm %s1410_s17, 4  ;;  %p1416_p4 = scmp.lt.s32.totalorder %s1410_s17, %s1960_s10 }
  0x36   : > { %1273 = vmatmul.msk.f32.vlgmr.msra.gmra.mxu3 %vm656_vm0, %v628_v10  ;;  %643 = vperm.xlu1 %1339, %v633_v11   ;;  %v417_v20 = vld [vmem:[%s1953_s3] sm:$0xf]  ;;  %p1412_p13 = scmp.ne.s32.totalorder %s1410_s17, %s1411_s20 }
  0x37   : > { %653 = vperm.xlu0 %1338, %v635_v12   ;;  %422 = vperm.xlu2 %1340, %v416_v13   ;;  %v1686_v29 = vld [vmem:[%s402_s14] sm:$0xff]  ;;  %s1415_s14 = scalar_lea.hbm %s1960_s10, 8 }
  0x38   : > { %p1413_p0 = pnand %p1412_p13, %p1577_p11  ;;  %p1417_p5 = scmp.lt.s32.totalorder %s1415_s14, %s1411_s20 }
  0x3a   : > { %p1414_p3 = pneg %p1413_p0  ;;  %p1418_p7 = por %p1417_p5, %p1416_p4 }
  0x3c   : > { %1262 = vmatmul.msk.f32.gmra.mxu0 %vm656_vm0, %v629_v14  ;;  %p1419_p8 = pnand %p1418_p7, %p1414_p3 }
  0x3d   : > { %1266 = vmatmul.msk.f32.gmra.mxu1 %vm656_vm0, %v629_v14  ;;  %1270 = vmatmul.msk.f32.gmra.mxu2 %vm656_vm0, %v629_v14 }
  0x3e   : > { %1274 = vmatmul.msk.f32.gmra.mxu3 %vm656_vm0, %v629_v14  ;;  %638 = vperm.xlu1 %1339, %v632_v15   ;;  %v801_v15 = vld [vmem:[%s1958_s8] sm:$0xff] }
  0x3f   : > { %648 = vperm.xlu0 %1338, %v634_v16   ;;  %433 = vperm.xlu2 %1340, %v418_v17  }
  0x44   : > { %1263 = vmatmul.msk.f32.gmra.mxu0 %vm656_vm0, %v630_v18 }
  0x45   : > { %1267 = vmatmul.msk.f32.gmra.mxu1 %vm656_vm0, %v630_v18  ;;  %1271 = vmatmul.msk.f32.gmra.mxu2 %vm656_vm0, %v630_v18 }
  0x46   : > { %1275 = vmatmul.msk.f32.gmra.mxu3 %vm656_vm0, %v630_v18  ;;  %1065 = vperm.xlu1 %1339, %v417_v20  }
  0x47   : > { %805 = vperm.xlu0 %1338, %v802_v19   ;;  %998 = vperm.xlu2 %1340, %v419_v22  }
  0x4c   : > { %1264 = vmatmul.msk.f32.gmra.mxu0 %vm656_vm0, %v631_v21 }
  0x4d   : > { %1268 = vmatmul.msk.f32.gmra.mxu1 %vm656_vm0, %v631_v21  ;;  %1272 = vmatmul.msk.f32.gmra.mxu2 %vm656_vm0, %v631_v21 }
  0x4e   : > { %1276 = vmatmul.msk.f32.gmra.mxu3 %vm656_vm0, %v631_v21 }
  0x91   : > { %v423_v27 = vpop.permute.xlu2 %422 }
  0x92   : > { %v1684_v28 = vperm.slane %v423_v27, %v1681_v26 }
  0x94   : > { %vm1061_vm1 = vcmp.ge.f32.partialorder %v1686_v29, %v1684_v28  ;;  %vm1062_vm2 = vcmp.ge.f32.partialorder %v1688_v30, %v1684_v28  ;;  %v429_v16 = vsub.f32 %v1686_v29, %v1684_v28 }
  0x99   : > { %v434_v8 = vpop.permute.xlu2 %433 }
  0x9a   : > { %v438_v17 = vperm.slane %v434_v8, %v1681_v26 }
  0x9c   : > { %v440_v27 = vmul.f32 %v438_v17, %v429_v16 }
  0xa8   : > { %v1676_v23 = vpop.permute.xlu1 %643 }
  0xa9   : > { %v654_v40 = vpop.permute.xlu0 %653 }
  0xb0   : > { %v639_v33 = vpop.permute.xlu1 %638 }
  0xb1   : > { %v686_v31 = vpop.f32.mrf.mxu0  ;;  %v649_v47 = vpop.permute.xlu0 %648 }
  0xb2   : > { %v715_v32 = vpop.f32.mrf.mxu1  ;;  %v687_v62 = vadd.f32 %v686_v31, %v639_v33 }
  0xb3   : > { %v716_v63 = vadd.f32 %v715_v32, %v639_v33 }
  0xb4   : > { %v785_v9 = vmax.f32 %v687_v62, 0.0 }
  0xb5   : > { %v786_v10 = vmax.f32 %v716_v63, 0.0 }
  0xb8   : > { %v744_v34 = vpop.f32.mrf.mxu2  ;;  %v1066_v38 = vpop.permute.xlu1 %1065 }
  0xb9   : > { %v773_v35 = vpop.f32.mrf.mxu3  ;;  %v689_v36 = vpop.f32.mrf.mxu0  ;;  %v1070_v39 = vperm.slane %v1066_v38, %v1681_v26  ;;  %v745_v18 = vadd.f32 %v744_v34, %v639_v33  ;;  %v518_v26 = vsub.f32 1.0, %v440_v27 }
  0xba   : > { %v718_v37 = vpop.f32.mrf.mxu1  ;;  %v690_v56 = vadd.f32 %v689_v36, %v1676_v23  ;;  %v774_v19 = vadd.f32 %v773_v35, %v639_v33 }
  0xbb   : > { %vm1072_vm3 = vcmp.le.f32.partialorder %v1686_v29, %v1070_v39  ;;  %vm1073_vm4 = vcmp.le.f32.partialorder %v1688_v30, %v1070_v39  ;;  %v719_v57 = vadd.f32 %v718_v37, %v1676_v23  ;;  %v787_v24 = vmax.f32 %v745_v18, 0.0 }
  0xbc   : > { %vm1697_vm5 = vmand %vm1061_vm1, %vm1072_vm3  ;;  %v789_v0 = vmax.f32 %v690_v56, 0.0  ;;  %v788_v25 = vmax.f32 %v774_v19, 0.0  ;;  %v430_v29 = vsub.f32 %v1688_v30, %v1684_v28  ;;  %v1721_v31 = vmin.f32 %v440_v27, %v518_v26 }
  0xbd   : > { %vm1701_vm6 = vmand %vm1062_vm2, %vm1073_vm4  ;;  %v790_v1 = vmax.f32 %v719_v57, 0.0 }
  0xbe   : > { %v441_v32 = vmul.f32 %v438_v17, %v430_v29  ;;  %1341 = vlog2.f32 %v1721_v31 }
  0xc0   : > { %v747_v43 = vpop.f32.mrf.mxu2  ;;  %v519_v33 = vsub.f32 1.0, %v441_v32  ;;  %v1737_v62 = vadd.f32 -0.5, %v441_v32 }
  0xc1   : > { %v776_v44 = vpop.f32.mrf.mxu3  ;;  %v692_v45 = vpop.f32.mrf.mxu0  ;;  %v748_v11 = vadd.f32 %v747_v43, %v1676_v23 }
  0xc2   : > { %v721_v46 = vpop.f32.mrf.mxu1  ;;  %v693_v54 = vadd.f32 %v692_v45, %v649_v47  ;;  %v777_v12 = vadd.f32 %v776_v44, %v1676_v23  ;;  %v1724_v35 = vmin.f32 %v441_v32, %v519_v33 }
  0xc3   : > { %v722_v55 = vadd.f32 %v721_v46, %v649_v47  ;;  %v791_v22 = vmax.f32 %v748_v11, 0.0 }
  0xc4   : > { %v793_v60 = vmax.f32 %v693_v54, 0.0  ;;  %v792_v23 = vmax.f32 %v777_v12, 0.0  ;;  %v1342_v34 = vpop.eup %1341  ;;  %1343 = vlog2.f32 %v1724_v35 }
  0xc5   : > { %v794_v61 = vmax.f32 %v722_v55, 0.0  ;;  %v523_v36 = vmul.f32 0.6931472, %v1342_v34 }
  0xc7   : > { %v526_v37 = vmul.f32 -2.0, %v523_v36 }
  0xc8   : > { %v750_v48 = vpop.f32.mrf.mxu2 }
  0xc9   : > { %v779_v49 = vpop.f32.mrf.mxu3  ;;  %v695_v50 = vpop.f32.mrf.mxu0  ;;  %v751_v4 = vadd.f32 %v750_v48, %v649_v47  ;;  %1345 = vrsqrt.f32 %v526_v37  ;;  %vm535_vm8 = vcmp.eq.f32.partialorder %v526_v37, inf  ;;  %v538_v54 = vand.u32 2147483648, %v526_v37 }
  0xca   : > { %v724_v51 = vpop.f32.mrf.mxu1  ;;  %v696_v52 = vadd.f32 %v695_v50, %v654_v40  ;;  %v780_v5 = vadd.f32 %v779_v49, %v649_v47  ;;  %v1344_v38 = vpop.eup %1343  ;;  %v1727_v50 = vadd.f32 -0.5, %v440_v27  ;;  %vm537_vm9 = vcmp.eq.f32.partialorder %v526_v37, 0.0 }
  0xcb   : > { %v725_v53 = vadd.f32 %v724_v51, %v654_v40  ;;  %v795_v20 = vmax.f32 %v751_v4, 0.0  ;;  %v525_v39 = vmul.f32 0.6931472, %v1344_v38 }
  0xcc   : > { %v797_v58 = vmax.f32 %v696_v52, 0.0  ;;  %v796_v21 = vmax.f32 %v780_v5, 0.0 }
  0xcd   : > { %v798_v59 = vmax.f32 %v725_v53, 0.0  ;;  %v527_v43 = vmul.f32 -2.0, %v525_v39  ;;  %v1731_v53 = vmul.f32 %v1727_v50, %v1727_v50 }
  0xce   : > { %824 = vmatpush.msrb.mxu0 %v797_v58 }
  0xcf   : > { %844 = vmatpush.msrb.mxu1 %v798_v59  ;;  %1347 = vrsqrt.f32 %v527_v43  ;;  %v468_v57 = vmul.f32 -54.476097, %v1731_v53  ;;  %vm547_vm10 = vcmp.eq.f32.partialorder %v527_v43, inf  ;;  %vm549_vm11 = vcmp.eq.f32.partialorder %v527_v43, 0.0 }
  0xd0   : > { %v753_v2 = vpop.f32.mrf.mxu2  ;;  %825 = vmatpush.msrb.mxu0 %v793_v60 }
  0xd1   : > { %v782_v3 = vpop.f32.mrf.mxu3  ;;  %845 = vmatpush.msrb.mxu1 %v794_v61  ;;  %v754_v6 = vadd.f32 %v753_v2, %v654_v40  ;;  %v470_v61 = vadd.f32 161.58583, %v468_v57  ;;  %v550_v2 = vand.u32 2147483648, %v527_v43 }
  0xd2   : > { %v783_v7 = vadd.f32 %v782_v3, %v654_v40  ;;  %826 = vmatpush.msrb.mxu0 %v789_v0  ;;  %v1346_v40 = vpop.eup %1345  ;;  %v1742_v3 = vmul.f32 %v1737_v62, %v1737_v62 }
  0xd3   : > { %846 = vmatpush.msrb.mxu1 %v790_v1  ;;  %v799_v13 = vmax.f32 %v754_v6, 0.0  ;;  %v529_v44 = vmul.f32 %v1346_v40, %v526_v37  ;;  %v472_v1 = vmul.f32 %v470_v61, %v1731_v53 }
  0xd4   : > { %v800_v14 = vmax.f32 %v783_v7, 0.0  ;;  %827 = vmatpush.msrb.mxu0 %v785_v9  ;;  %v469_v8 = vmul.f32 -54.476097, %v1742_v3  ;;  %v447_v36 = vmul.f32 -39.69683, %v1742_v3 }
  0xd5   : > { %847 = vmatpush.msrb.mxu1 %v786_v10  ;;  %864 = vmatpush.msrb.mxu2 %v799_v13  ;;  %v530_v28 = vmul.f32 %v1346_v40, %v529_v44  ;;  %v1348_v45 = vpop.eup %1347  ;;  %v474_v6 = vadd.f32 -155.69897, %v472_v1 }
  0xd6   : > { %884 = vmatpush.msrb.mxu3 %v800_v14  ;;  %1277 = vmatmul.msk.f32.vlgmr.msrb.gmra.mxu0 %vm808_vm7, %v801_v15  ;;  %v541_v47 = vmul.f32 %v1348_v45, %v527_v43  ;;  %v471_v12 = vadd.f32 161.58583, %v469_v8  ;;  %v449_v44 = vadd.f32 220.9461, %v447_v36 }
  0xd7   : > { %1278 = vmatmul.msk.f32.vlgmr.msrb.gmra.mxu1 %vm808_vm7, %v801_v15  ;;  %865 = vmatpush.msrb.mxu2 %v795_v20  ;;  %v531_v30 = vmul.f32 0.5, %v530_v28  ;;  %v476_v11 = vmul.f32 %v474_v6, %v1731_v53  ;;  %v446_v20 = vmul.f32 -39.69683, %v1731_v53 }
  0xd8   : > { %885 = vmatpush.msrb.mxu3 %v796_v21  ;;  %v542_v49 = vmul.f32 %v1348_v45, %v541_v47  ;;  %v473_v16 = vmul.f32 %v471_v12, %v1742_v3 }
  0xd9   : > { %866 = vmatpush.msrb.mxu2 %v791_v22  ;;  %v532_v46 = vsub.f32 1.5, %v531_v30  ;;  %v448_v27 = vadd.f32 220.9461, %v446_v20  ;;  %v806_v20 = vpop.permute.xlu0 %805 }
  0xda   : > { %886 = vmatpush.msrb.mxu3 %v792_v23  ;;  %v543_v52 = vmul.f32 0.5, %v542_v49  ;;  %v475_v21 = vadd.f32 -155.69897, %v473_v16  ;;  %v451_v49 = vmul.f32 %v449_v44, %v1742_v3 }
  0xdb   : > { %867 = vmatpush.msrb.mxu2 %v787_v24  ;;  %v533_v48 = vmul.f32 %v1346_v40, %v532_v46 }
  0xdc   : > { %887 = vmatpush.msrb.mxu3 %v788_v25  ;;  %1279 = vmatmul.msk.f32.vlgmr.msrb.gmra.mxu2 %vm808_vm7, %v801_v15  ;;  %v544_v56 = vsub.f32 1.5, %v543_v52  ;;  %v477_v26 = vmul.f32 %v475_v21, %v1742_v3 }
  0xdd   : > { %1280 = vmatmul.msk.f32.vlgmr.msrb.gmra.mxu3 %vm808_vm7, %v801_v15  ;;  %v534_v51 = vmul.f32 %v533_v48, %v526_v37  ;;  %v478_v15 = vadd.f32 66.801315, %v476_v11 }
  0xde   : > { %v545_v59 = vmul.f32 %v1348_v45, %v544_v56  ;;  %v479_v38 = vadd.f32 66.801315, %v477_v26 }
  0xdf   : > { %v536_v55 = vsel %vm535_vm8, %v526_v37, %v534_v51  ;;  %v480_v19 = vmul.f32 %v478_v15, %v1731_v53  ;;  %v450_v37 = vmul.f32 %v448_v27, %v1731_v53 }
  0xe0   : > { %v1734_v58 = vsel %vm537_vm9, %v538_v54, %v536_v55  ;;  %v546_v63 = vmul.f32 %v545_v59, %v527_v43  ;;  %v481_v30 = vmul.f32 %v479_v38, %v1742_v3  ;;  %v453_v59 = vadd.f32 -275.9285, %v451_v49 }
  0xe1   : > { %v572_v60 = vmul.f32 0.007784696, %v1734_v58  ;;  %v552_v22 = vmul.f32 -0.007784894, %v1734_v58  ;;  %v482_v25 = vadd.f32 -13.280682, %v480_v19 }
  0xe2   : > { %v548_v4 = vsel %vm547_vm10, %v527_v43, %v546_v63  ;;  %v452_v28 = vadd.f32 -275.9285, %v450_v37  ;;  %v483_v52 = vadd.f32 -13.280682, %v481_v30  ;;  %vm618_vm10 = vcmp.lt.f32.partialorder %v1727_v50, 0.0 }
  0xe3   : > { %v574_v0 = vadd.f32 0.32246712, %v572_v60  ;;  %v1745_v7 = vsel %vm549_vm11, %v550_v2, %v548_v4  ;;  %v554_v29 = vadd.f32 -0.32239646, %v552_v22  ;;  %v484_v34 = vmul.f32 %v482_v25, %v1731_v53 }
  0xe4   : > { %v573_v9 = vmul.f32 0.007784696, %v1745_v7  ;;  %v553_v45 = vmul.f32 -0.007784894, %v1745_v7  ;;  %v454_v51 = vmul.f32 %v452_v28, %v1731_v53  ;;  %v485_v61 = vmul.f32 %v483_v52, %v1742_v3 }
  0xe5   : > { %v576_v5 = vmul.f32 %v574_v0, %v1734_v58  ;;  %v556_v39 = vmul.f32 %v554_v29, %v1734_v58  ;;  %v1766_v43 = vadd.f32 1.0, %v484_v34  ;;  %v455_v4 = vmul.f32 %v453_v59, %v1742_v3 }
  0xe6   : > { %v575_v13 = vadd.f32 0.32246712, %v573_v9  ;;  %v555_v54 = vadd.f32 -0.32239646, %v553_v45  ;;  %v456_v60 = vadd.f32 138.35776, %v454_v51 }
  0xe7   : > { %v578_v10 = vadd.f32 2.4451342, %v576_v5  ;;  %v558_v46 = vadd.f32 -2.4007583, %v556_v39  ;;  %v1788_v6 = vadd.f32 1.0, %v485_v61  ;;  %vm493_vm15 = vweird.f32 %v1766_v43 }
  0xe8   : > { %v577_v17 = vmul.f32 %v575_v13, %v1745_v7  ;;  %v557_v0 = vmul.f32 %v555_v54, %v1745_v7  ;;  %v458_v5 = vmul.f32 %v456_v60, %v1731_v53  ;;  %v457_v13 = vadd.f32 138.35776, %v455_v4 }
  0xe9   : > { %v580_v14 = vmul.f32 %v578_v10, %v1734_v58  ;;  %v560_v55 = vmul.f32 %v558_v46, %v1734_v58  ;;  %v497_v28 = vand.u32 2147483647, %v1766_v43  ;;  %v499_v30 = vand.u32 2147483648, %v1766_v43 }
  0xea   : > { %v579_v23 = vadd.f32 2.4451342, %v577_v17  ;;  %v559_v9 = vadd.f32 -2.4007583, %v557_v0  ;;  %vm508_vm8 = vweird.f32 %v1788_v6 }
  0xeb   : > { %v582_v18 = vadd.f32 3.7544086, %v580_v14  ;;  %v562_v1 = vadd.f32 -2.5497324, %v560_v55  ;;  %v460_v14 = vadd.f32 -30.664799, %v458_v5 }
  0xec   : > { %v581_v32 = vmul.f32 %v579_v23, %v1745_v7  ;;  %v561_v16 = vmul.f32 %v559_v9, %v1745_v7  ;;  %v459_v23 = vmul.f32 %v457_v13, %v1742_v3  ;;  %vm498_vm3 = vcmp.eq.f32.partialorder %v497_v28, 8.507059e+37 }
  0xed   : > { %v584_v24 = vmul.f32 %v582_v18, %v1734_v58  ;;  %v564_v10 = vmul.f32 %v562_v1, %v1734_v58  ;;  %v500_v59 = vor.u32 1.1754944e-38, %v499_v30 }
  0xee   : > { %v583_v40 = vadd.f32 3.7544086, %v581_v32  ;;  %v563_v32 = vadd.f32 -2.5497324, %v561_v16  ;;  %v461_v54 = vadd.f32 -30.664799, %v459_v23 }
  0xef   : > { %v1759_v33 = vadd.f32 1.0, %v584_v24  ;;  %v566_v17 = vadd.f32 4.3746643, %v564_v10  ;;  %v462_v24 = vmul.f32 %v460_v14, %v1731_v53 }
  0xf0   : > { %v585_v47 = vmul.f32 %v583_v40, %v1745_v7  ;;  %v565_v46 = vmul.f32 %v563_v32, %v1745_v7  ;;  %v463_v4 = vmul.f32 %v461_v54, %v1742_v3  ;;  %v512_v32 = vand.u32 2147483647, %v1788_v6 }
  0xf1   : > { %1349 = vrcp.f32 %v1759_v33  ;;  %vm593_vm12 = vweird.f32 %v1759_v33  ;;  %v597_v18 = vand.u32 2147483647, %v1759_v33  ;;  %v599_v19 = vand.u32 2147483648, %v1759_v33 }
  0xf2   : > { %1351 = vrcp.f32 %v1766_v43  ;;  %v1777_v56 = vadd.f32 1.0, %v585_v47  ;;  %v464_v55 = vadd.f32 2.5066283, %v462_v24  ;;  %v567_v60 = vadd.f32 4.3746643, %v565_v46 }
  0xf3   : > { %vm598_vm1 = vcmp.eq.f32.partialorder %v597_v18, 8.507059e+37  ;;  %v600_v53 = vor.u32 1.1754944e-38, %v599_v19  ;;  %v514_v24 = vand.u32 2147483648, %v1788_v6 }
  0xf4   : > { %1353 = vrcp.f32 %v1777_v56  ;;  %vm608_vm4 = vweird.f32 %v1777_v56  ;;  %v612_v1 = vand.u32 2147483647, %v1777_v56 }
  0xf5   : > { %1355 = vrcp.f32 %v1788_v6 }
  0xf6   : > { %vm1859_vm11 = vcmp.eq.f32.partialorder %v612_v1, 8.507059e+37 }
  0xf7   : > { %v1772_v48 = vpop.eup %1349 }
  0xf8   : > { %v589_v57 = vmul.f32 %v1772_v48, %v1759_v33  ;;  %v1782_v63 = vpop.eup %1351  ;;  %vm594_vm13 = vweird.f32 %v1772_v48  ;;  %v568_v33 = vmul.f32 %v566_v17, %v1734_v58 }
  0xf9   : > { %v489_v8 = vmul.f32 %v1782_v63, %v1766_v43  ;;  %vm1808_vm14 = vmor %vm593_vm12, %vm594_vm13  ;;  %vm494_vm0 = vweird.f32 %v1782_v63  ;;  %vm914_vm12 = vcmask 1043456  }
  0xfa   : > { %v590_v2 = vsub.f32 1.0, %v589_v57  ;;  %v1794_v12 = vpop.eup %1353  ;;  %vm1829_vm2 = vmor %vm493_vm15, %vm494_vm0  ;;  %v570_v47 = vadd.f32 2.938164, %v568_v33  ;;  %vm513_vm0 = vcmp.eq.f32.partialorder %v512_v32, 8.507059e+37 }
  0xfb   : > { %v490_v15 = vsub.f32 1.0, %v489_v8  ;;  %v604_v22 = vmul.f32 %v1794_v12, %v1777_v56  ;;  %v1817_v37 = vpop.eup %1355  ;;  %vm609_vm7 = vweird.f32 %v1794_v12 }
  0xfc   : > { %v591_v11 = vmul.f32 %v1772_v48, %v590_v2  ;;  %v504_v51 = vmul.f32 %v1817_v37, %v1788_v6  ;;  %v614_v2 = vand.u32 2147483648, %v1777_v56  ;;  %vm1848_vm9 = vmor %vm608_vm4, %vm609_vm7  ;;  %v569_v56 = vmul.f32 %v567_v60, %v1745_v7 }
  0xfd   : > { %v491_v25 = vmul.f32 %v1782_v63, %v490_v15  ;;  %v605_v39 = vsub.f32 1.0, %v604_v22  ;;  %vm509_vm13 = vweird.f32 %v1817_v37 }
  0xfe   : > { %v592_v21 = vadd.f32 %v1772_v48, %v591_v11  ;;  %v505_v0 = vsub.f32 1.0, %v504_v51  ;;  %v615_v19 = vor.u32 1.1754944e-38, %v614_v2  ;;  %vm1882_vm15 = vmor %vm508_vm8, %vm509_vm13  ;;  %vm1138_vm13 = vcmask 1040384  }
  0xff   : > { %v492_v44 = vadd.f32 %v1782_v63, %v491_v25  ;;  %v606_v57 = vmul.f32 %v1794_v12, %v605_v39  ;;  %v571_v25 = vadd.f32 2.938164, %v569_v56  ;;  %v515_v39 = vor.u32 1.1754944e-38, %v514_v24 }
 0x100   : > { %v596_v38 = vsel %vm1808_vm14, %v1772_v48, %v592_v21  ;;  %v506_v17 = vmul.f32 %v1817_v37, %v505_v0  ;;  %vm624_vm14 = vcmp.lt.f32.partialorder %v1721_v31, 0.02425 }
 0x101   : > { %v601_v52 = vsel %vm598_vm1, %v600_v53, %v596_v38  ;;  %v496_v43 = vsel %vm1829_vm2, %v1782_v63, %v492_v44  ;;  %v607_v5 = vadd.f32 %v1794_v12, %v606_v57  ;;  %v466_v63 = vmul.f32 %v1727_v50, %v464_v55 }
 0x102   : > { %v602_v61 = vmul.f32 %v601_v52, %v570_v47  ;;  %v501_v8 = vsel %vm498_vm3, %v500_v59, %v496_v43  ;;  %v465_v50 = vadd.f32 2.5066283, %v463_v4  ;;  %vm619_vm1 = vcmp.lt.f32.partialorder %v1737_v62, 0.0 }
 0x103   : > { %v611_v7 = vsel %vm1848_vm9, %v1794_v12, %v607_v5  ;;  %v502_v23 = vmul.f32 %v501_v8, %v466_v63  ;;  %v507_v12 = vadd.f32 %v1817_v37, %v506_v17  ;;  %vm625_vm2 = vcmp.lt.f32.partialorder %v1724_v35, 0.02425 }
 0x104   : > { %v620_v14 = vsub.f32 0.0, %v602_v61  ;;  %v616_v33 = vsel %vm1859_vm11, %v615_v19, %v611_v7  ;;  %v467_v6 = vmul.f32 %v1737_v62, %v465_v50  ;;  %v1468_v63 = vmov 0.0  }
 0x105   : > { %v511_v44 = vsel %vm1882_vm15, %v1817_v37, %v507_v12  ;;  %vm1142_vm15 = vcmask 1041408  }
 0x106   : > { %v622_v27 = vsel %vm618_vm10, %v602_v61, %v620_v14  ;;  %v516_v47 = vsel %vm513_vm0, %v515_v39, %v511_v44  ;;  %v1077_v44 = vsel %vm1701_vm6, 1.0, %v1468_v63 }
 0x107   : > { %v626_v38 = vsel %vm624_vm14, %v622_v27, %v502_v23  ;;  %v517_v55 = vmul.f32 %v516_v47, %v467_v6  ;;  %vm1140_vm14 = vcmask 1042434  }
 0x108   : > { %v904_v30 = vmul.f32 0.5, %v626_v38  ;;  %v1006_v61 = vand.u32 2147483647, %v626_v38 }
 0x10a   : > { %v906_v52 = vmul.f32 %v904_v30, %v626_v38  ;;  %vm1008_vm3 = vcmp.lt.f32.partialorder %v1006_v61, inf }
 0x10b   : > { %v1010_v8 = vsel %vm1008_vm3, 1.0, %v1468_v63 }
 0x153   : > { %v829_v26 = vpop.f32.mrf.mxu0 }
 0x154   : > { %v849_v29 = vpop.f32.mrf.mxu1  ;;  %v1813_v34 = vadd.f32 %v829_v26, %v806_v20 }
 0x155   : > { %v1815_v36 = vadd.f32 %v849_v29, %v806_v20 }
 0x156   : > { %v892_v40 = vsub.f32 0.0, %v1813_v34 }
 0x157   : > { %v893_v58 = vsub.f32 0.0, %v1815_v36  ;;  %v912_v21 = vrot.slane %v1815_v36, 4 }
 0x158   : > { %v896_v49 = vmul.f32 1.442695, %v892_v40  ;;  %v617_v40 = vmul.f32 %v616_v33, %v571_v25 }
 0x159   : > { %v898_v48 = vmul.f32 1.442695, %v893_v58  ;;  %v915_v53 = vsel %vm914_vm12, %v1813_v34, %v912_v21 }
 0x15a   : > { %1357 = vpow2.f32 %v896_v49  ;;  %v919_v58 = vsub.f32 %v626_v38, %v915_v53  ;;  %v621_v49 = vsub.f32 0.0, %v617_v40 }
 0x15b   : > { %1359 = vpow2.f32 %v898_v48 }
 0x15c   : > { %v623_v57 = vsel %vm619_vm1, %v617_v40, %v621_v49 }
 0x15d   : > { %v627_v59 = vsel %vm625_vm2, %v623_v57, %v517_v55 }
 0x15e   : > { %v905_v1 = vmul.f32 0.5, %v627_v59  ;;  %v1007_v56 = vand.u32 2147483647, %v627_v59 }
 0x15f   : > { %v869_v10 = vpop.f32.mrf.mxu2 }
 0x160   : > { %v889_v11 = vpop.f32.mrf.mxu3  ;;  %v1358_v13 = vpop.eup %1357  ;;  %v1854_v3 = vadd.f32 %v869_v10, %v806_v20  ;;  %v907_v35 = vmul.f32 %v905_v1, %v627_v59  ;;  %vm1009_vm4 = vcmp.lt.f32.partialorder %v1007_v56, inf }
 0x161   : > { %v1856_v15 = vadd.f32 %v889_v11, %v806_v20  ;;  %v1360_v16 = vpop.eup %1359  ;;  %925 = vst.sshfl [vmem:[#allocation1] sm:$0xff pattern:$0x75316420] %v1358_v13  ;;  %v1011_v19 = vsel %vm1009_vm4, 1.0, %v1468_v63 }
 0x162   : > { %926 = vst.sshfl [vmem:[#allocation1 + $0x8] sm:$0xff pattern:$0x75316420] %v1360_v16  ;;  %v894_v20 = vsub.f32 0.0, %v1854_v3  ;;  %v1076_v16 = vsel %vm1697_vm5, 1.0, %v1468_v63 }
 0x163   : > { %v895_v22 = vsub.f32 0.0, %v1856_v15  ;;  %v913_v37 = vrot.slane %v1856_v15, 4 }
 0x164   : > { %v900_v26 = vmul.f32 1.442695, %v894_v20 }
 0x165   : > { %v902_v29 = vmul.f32 1.442695, %v895_v22 }
 0x166   : > { %1361 = vpow2.f32 %v900_v26 }
 0x167   : > { %1363 = vpow2.f32 %v902_v29 }
 0x169   : > { %v930_v28 = vld [vmem:[#allocation1 + $0x1] ss:$2 sm:$0xff] }
 0x16a   : > { %v935_v45 = vmul.f32 %v930_v28, %v919_v58  ;;  %943 = vst.sshfl [vmem:[#allocation1] sm:$0xff pattern:$0x75316420] %v1813_v34 }
 0x16b   : > { %944 = vst.sshfl [vmem:[#allocation1 + $0x8] sm:$0xff pattern:$0x75316420] %v1815_v36  ;;  %v916_v36 = vsel %vm914_vm12, %v1854_v3, %v913_v37 }
 0x16c   : > { %v1362_v46 = vpop.eup %1361  ;;  %v937_v48 = vmul.f32 %v935_v45, %v935_v45  ;;  %v920_v0 = vsub.f32 %v627_v59, %v916_v36 }
 0x16d   : > { %v1364_v51 = vpop.eup %1363  ;;  %927 = vst.sshfl [vmem:[#allocation1 + $0x10] sm:$0xff pattern:$0x75316420] %v1362_v46 }
 0x16e   : > { %v939_v54 = vmul.f32 0.5, %v937_v48  ;;  %928 = vst.sshfl [vmem:[#allocation1 + $0x18] sm:$0xff pattern:$0x75316420] %v1364_v51 }
 0x170   : > { %v941_v34 = vsub.f32 %v906_v52, %v939_v54 }
 0x172   : > { %v948_v43 = vld [vmem:[#allocation1 + $0x1] ss:$2 sm:$0xff] }
 0x173   : > { %v953_v60 = vsub.f32 %v941_v34, %v948_v43 }
 0x175   : > { %957 = vst [vmem:[#allocation1] ss:$2 sm:$0xff] %v953_v60  ;;  %v932_v62 = vld [vmem:[#allocation1 + $0x11] ss:$2 sm:$0xff] }
 0x176   : > { %v936_v2 = vmul.f32 %v932_v62, %v920_v0  ;;  %945 = vst.sshfl [vmem:[#allocation1 + $0x10] sm:$0xff pattern:$0x75316420] %v1854_v3 }
 0x177   : > { %946 = vst.sshfl [vmem:[#allocation1 + $0x18] sm:$0xff pattern:$0x75316420] %v1856_v15 }
 0x178   : > { %v938_v4 = vmul.f32 %v936_v2, %v936_v2 }
 0x17a   : > { %v940_v5 = vmul.f32 0.5, %v938_v4 }
 0x17c   : > { %v960_v9 = vld.sshfl [vmem:[#allocation1] sm:$0xff pattern:$0x75316420]  ;;  %v961_v10 = vld.sshfl [vmem:[#allocation1 + $0x8] sm:$0xff pattern:$0x75316420]  ;;  %v942_v11 = vsub.f32 %v907_v35, %v940_v5 }
 0x17d   : > { %1014 = vst [vmem:[#allocation1] ss:$2 sm:$0xff] %v1010_v8  ;;  %v975_v3 = vsel %vm914_vm12, %v961_v10, 0.0  ;;  %v968_v21 = vsel %vm914_vm12, %v960_v9, 0.0 }
 0x17e   : > { %v950_v13 = vld [vmem:[#allocation1 + $0x11] ss:$2 sm:$0xff]  ;;  %v976_v7 = vrot.slane %v975_v3, 4  ;;  %v969_v24 = vrot.slane %v968_v21, 4 }
 0x17f   : > { %v954_v14 = vsub.f32 %v942_v11, %v950_v13 }
 0x180   : > { %v977_v27 = vadd.f32 %v976_v7, %v975_v3  ;;  %v970_v38 = vadd.f32 %v969_v24, %v968_v21 }
 0x181   : > { %959 = vst [vmem:[#allocation1 + $0x10] ss:$2 sm:$0xff] %v954_v14 }
 0x182   : > { %v978_v28 = vrot.slane %v977_v27, 2  ;;  %v971_v52 = vrot.slane %v970_v38, 2 }
 0x184   : > { %v1017_v15 = vld.sshfl [vmem:[#allocation1] sm:$0xff pattern:$0x75316420]  ;;  %v1018_v17 = vld.sshfl [vmem:[#allocation1 + $0x8] sm:$0xff pattern:$0x75316420]  ;;  %v979_v34 = vadd.f32 %v978_v28, %v977_v27  ;;  %v972_v1 = vadd.f32 %v971_v52, %v970_v38 }
 0x185   : > { %v1032_v18 = vsel %vm914_vm12, %v1018_v17, inf  ;;  %1080 = vst [vmem:[#allocation1] ss:$2 sm:$0xff] %v1076_v16  ;;  %v1025_v26 = vsel %vm914_vm12, %v1017_v15, inf }
 0x186   : > { %v1033_v20 = vrot.slane %v1032_v18, 4  ;;  %v1026_v39 = vrot.slane %v1025_v26, 4  ;;  %v980_v5 = vrot.slane %v979_v34, 1  ;;  %v973_v7 = vrot.slane %v972_v1, 1 }
 0x188   : > { %v962_v22 = vld.sshfl [vmem:[#allocation1 + $0x10] sm:$0xff pattern:$0x75316420]  ;;  %v963_v23 = vld.sshfl [vmem:[#allocation1 + $0x18] sm:$0xff pattern:$0x75316420]  ;;  %v1034_v29 = vmin.f32 %v1032_v18, %v1033_v20  ;;  %v1027_v54 = vmin.f32 %v1025_v26, %v1026_v39  ;;  %v981_v26 = vadd.f32 %v980_v5, %v979_v34  ;;  %v1145_v34 = vlaneseq }
 0x189   : > { %1016 = vst [vmem:[#allocation1 + $0x10] ss:$2 sm:$0xff] %v1011_v19  ;;  %v982_v41 = vsel %vm914_vm12, %v962_v22, 0.0  ;;  %v989_v25 = vsel %vm914_vm12, %v963_v23, 0.0  ;;  %v999_v23 = vpop.permute.xlu2 %998 }
 0x18a   : > { %v983_v33 = vrot.slane %v982_v41, 4  ;;  %v990_v53 = vrot.slane %v989_v25, 4  ;;  %v1035_v30 = vrot.slane %v1034_v29, 2  ;;  %v1028_v2 = vrot.slane %v1027_v54, 2 }
 0x18b   : > { %vm1147_vm0 = vcmp.lt.s32.totalorder %v1145_v34, 512 }
 0x18c   : > { %v1083_v12 = vld.sshfl [vmem:[#allocation1] sm:$0xff pattern:$0x75316420]  ;;  %v1084_v32 = vld.sshfl [vmem:[#allocation1 + $0x8] sm:$0xff pattern:$0x75316420]  ;;  %v984_v49 = vadd.f32 %v983_v33, %v982_v41  ;;  %v991_v48 = vadd.f32 %v990_v53, %v989_v25  ;;  %v1036_v42 = vmin.f32 %v1034_v29, %v1035_v30  ;;  %v1029_v17 = vmin.f32 %v1027_v54, %v1028_v2 }
 0x18d   : > { %v1091_v31 = vsel %vm914_vm12, %v1083_v12, inf  ;;  %v1098_v50 = vsel %vm914_vm12, %v1084_v32, inf }
 0x18e   : > { %v1092_v40 = vrot.slane %v1091_v31, 4  ;;  %v1099_v58 = vrot.slane %v1098_v50, 4  ;;  %v985_v61 = vrot.slane %v984_v49, 2  ;;  %v992_v0 = vrot.slane %v991_v48, 2 }
 0x18f   : > { %v1037_v63 = vrot.slane %v1036_v42, 1  ;;  %v1030_v32 = vrot.slane %v1029_v17, 1 }
 0x190   : > { %v1019_v45 = vld.sshfl [vmem:[#allocation1 + $0x10] sm:$0xff pattern:$0x75316420]  ;;  %v1020_v6 = vld.sshfl [vmem:[#allocation1 + $0x18] sm:$0xff pattern:$0x75316420]  ;;  %v1093_v46 = vmin.f32 %v1091_v31, %v1092_v40  ;;  %v1100_v47 = vmin.f32 %v1098_v50, %v1099_v58  ;;  %v986_v14 = vadd.f32 %v985_v61, %v984_v49  ;;  %v993_v16 = vadd.f32 %v992_v0, %v991_v48 }
 0x191   : > { %v1039_v51 = vsel %vm914_vm12, %v1019_v45, inf  ;;  %v1046_v37 = vsel %vm914_vm12, %v1020_v6, inf  ;;  %1082 = vst [vmem:[#allocation1 + $0x10] ss:$2 sm:$0xff] %v1077_v44  ;;  %v1038_v24 = vmin.f32 %v1036_v42, %v1037_v63  ;;  %v1001_v31 = vperm.slane %v999_v23, 0 }
 0x192   : > { %v1040_v55 = vrot.slane %v1039_v51, 4  ;;  %v1047_v57 = vrot.slane %v1046_v37, 4  ;;  %v1094_v36 = vrot.slane %v1093_v46, 2  ;;  %v1101_v43 = vrot.slane %v1100_v47, 2 }
 0x193   : > { %v987_v29 = vrot.slane %v986_v14, 1  ;;  %v994_v12 = vrot.slane %v993_v16, 1  ;;  %v974_v50 = vadd.f32 %v973_v7, %v972_v1  ;;  %vm1054_vm6 = vcmp.gt.f32.partialorder %v1038_v24, 0.5 }
 0x194   : > { %v1041_v59 = vmin.f32 %v1039_v51, %v1040_v55  ;;  %v1048_v60 = vmin.f32 %v1046_v37, %v1047_v57  ;;  %v1102_v62 = vmin.f32 %v1100_v47, %v1101_v43  ;;  %v1095_v8 = vmin.f32 %v1093_v46, %v1094_v36 }
 0x195   : > { %v988_v28 = vadd.f32 %v987_v29, %v986_v14  ;;  %v995_v30 = vadd.f32 %v994_v12, %v993_v16  ;;  %v1003_v45 = vadd.f32 %v1001_v31, %v981_v26  ;;  %v1031_v46 = vmin.f32 %v1029_v17, %v1030_v32 }
 0x196   : > { %v1042_v4 = vrot.slane %v1041_v59, 2  ;;  %v1049_v35 = vrot.slane %v1048_v60, 2  ;;  %v1103_v9 = vrot.slane %v1102_v62, 1  ;;  %v1096_v22 = vrot.slane %v1095_v8, 1 }
 0x197   : > { %v1058_v48 = vsel %vm1054_vm6, %v1003_v45, -inf  ;;  %v1002_v54 = vadd.f32 %v1001_v31, %v974_v50  ;;  %v1004_v55 = vadd.f32 %v1001_v31, %v988_v28  ;;  %v1005_v57 = vadd.f32 %v1001_v31, %v995_v30 }
 0x198   : > { %v1043_v10 = vmin.f32 %v1041_v59, %v1042_v4  ;;  %v1050_v11 = vmin.f32 %v1048_v60, %v1049_v35  ;;  %v1085_v13 = vld.sshfl [vmem:[#allocation1 + $0x10] sm:$0xff pattern:$0x75316420]  ;;  %v1086_v56 = vld.sshfl [vmem:[#allocation1 + $0x18] sm:$0xff pattern:$0x75316420]  ;;  %v1104_v18 = vmin.f32 %v1102_v62, %v1103_v9  ;;  %v1097_v39 = vmin.f32 %v1095_v8, %v1096_v22 }
 0x199   : > { %v1105_v3 = vsel %vm914_vm12, %v1085_v13, inf  ;;  %v1112_v15 = vsel %vm914_vm12, %v1086_v56, inf  ;;  %vm1053_vm10 = vcmp.gt.f32.partialorder %v1031_v46, 0.5 }
 0x19a   : > { %v1106_v19 = vrot.slane %v1105_v3, 4  ;;  %v1113_v21 = vrot.slane %v1112_v15, 4  ;;  %v1044_v20 = vrot.slane %v1043_v10, 1  ;;  %v1051_v41 = vrot.slane %v1050_v11, 1 }
 0x19b   : > { %vm1120_vm5 = vcmp.gt.f32.partialorder %v1104_v18, 0.5  ;;  %vm1119_vm8 = vcmp.gt.f32.partialorder %v1097_v39, 0.5  ;;  %v1057_v1 = vsel %vm1053_vm10, %v1002_v54, -inf }
 0x19c   : > { %v1107_v25 = vmin.f32 %v1105_v3, %v1106_v19  ;;  %v1114_v27 = vmin.f32 %v1112_v15, %v1113_v21  ;;  %v1045_v38 = vmin.f32 %v1043_v10, %v1044_v20  ;;  %v1052_v40 = vmin.f32 %v1050_v11, %v1051_v41 }
 0x19d   : > { %v1124_v6 = vsel %vm1120_vm5, %v1001_v31, -inf  ;;  %v1123_v42 = vsel %vm1119_vm8, %v1001_v31, -inf }
 0x19e   : > { %v1108_v33 = vrot.slane %v1107_v25, 2  ;;  %v1115_v53 = vrot.slane %v1114_v27, 2  ;;  %vm1055_vm7 = vcmp.gt.f32.partialorder %v1045_v38, 0.5  ;;  %vm1056_vm9 = vcmp.gt.f32.partialorder %v1052_v40, 0.5 }
 0x19f   : > { %v1128_v52 = vsub.f32 %v1058_v48, %v1124_v6  ;;  %v1059_v36 = vsel %vm1055_vm7, %v1004_v55, -inf  ;;  %v1060_v43 = vsel %vm1056_vm9, %v1005_v57, -inf  ;;  %v1127_v2 = vsub.f32 %v1057_v1, %v1123_v42 }
 0x1a0   : > { %v1109_v58 = vmin.f32 %v1107_v25, %v1108_v33  ;;  %v1116_v44 = vmin.f32 %v1114_v27, %v1115_v53 }
 0x1a1   : > { %v1135_v62 = vrot.slane %v1128_v52, 7 }
 0x1a2   : > { %v1110_v47 = vrot.slane %v1109_v58, 1  ;;  %v1117_v49 = vrot.slane %v1116_v44, 1 }
 0x1a3   : > { %v1139_v5 = vsel %vm1138_vm13, %v1127_v2, %v1135_v62 }
 0x1a4   : > { %v1111_v51 = vmin.f32 %v1109_v58, %v1110_v47  ;;  %v1118_v37 = vmin.f32 %v1116_v44, %v1117_v49 }
 0x1a6   : > { %vm1121_vm11 = vcmp.gt.f32.partialorder %v1111_v51, 0.5  ;;  %vm1122_vm12 = vcmp.gt.f32.partialorder %v1118_v37, 0.5 }
 0x1a7   : > { %v1125_v59 = vsel %vm1121_vm11, %v1001_v31, -inf  ;;  %v1126_v60 = vsel %vm1122_vm12, %v1001_v31, -inf }
 0x1a8   : > { %v1129_v61 = vsub.f32 %v1059_v36, %v1125_v59  ;;  %v1130_v0 = vsub.f32 %v1060_v43, %v1126_v60 }
 0x1aa   : > { %v1136_v4 = vrot.slane %v1129_v61, 6  ;;  %v1137_v35 = vrot.slane %v1130_v0, 5 }
 0x1ac   : > { %v1141_v63 = vsel %vm1140_vm14, %v1136_v4, %v1137_v35 }
 0x1ad   : > { %v1143_v8 = vsel %vm1142_vm15, %v1139_v5, %v1141_v63 }
 0x1ae   : > { %1149 = vst.msk [vmem:[%s397_s12] sm:$0xf] %vm1147_vm0, %v1143_v8 }
 0x1af   : > { %1422 = shalt.err (!%p1419_p8)
}
 0x1b0   : > { %1288 = dma.vmem_to_hbm [thread:$0]  (%p1577_p11), %s1164_s28, 64, %s1166_s13, %s1151_s21  }
 0x1b1 PF: > { %s1177_s29 = sand.u32 1, %s1449_s15   ;;  %p1295_p10 = pnand %p1250_p9, %p1581_p12 }
 0x1b2   : > { %s1178_s19 = scalar_lea.sflag [#allocation5], %s1177_s29 }
 0x1b3   : > { %p1296_p1 = pneg %p1295_p10 }
 0x1b5   : > { %1444 = dma.done.wait (%p1296_p1), %s1178_s19, 64  }
 0x1b6   : > { %1446 = vsyncadd (%p1296_p1), %s1178_s19, 4294967232  ;;  %s1986_s18 = sld [smem:[#allocation10_spill]]  ;;  %s1989_s15 = smov %s1453_s16 }
 0x1b7   : > { %s1987_s22 = sld [smem:[#allocation9_spill]] }
 0x1b8   : > { %s1988_s17 = sld [smem:[#allocation11_spill]] }
 0x1bc   : > { %p25_p2 = scmp.ge.s32.totalorder %s1986_s18, 4  }
 0x1bd   : > { %s1990_s16 = smov %s1987_s22 }
 0x1be   :  { %27 = sbr.rel (!%p25_p2) target bundleno = 8 (0x8), region = 115 }
 0x1c3   :  { %1184 = vsyncpa [#allocation4], 1 }
 0x1c4   :  { %1186 = vsyncpa [#allocation4 + $0x1], 1 }
 0x1c5   :  { %1187 = vsyncpa [#allocation5], 1 }
 0x1c6   :  { %1189 = vsyncpa [#allocation5 + $0x1], 1 }

</bundles_post_ra>
